<compile_context>
chip_gen: v5e
topology: v5e:2x2
jax: 0.10.0
libtpu: 0.0.40
codegen_flags: <defaults>
</compile_context>

<pallas_src>
import functools

import numpy as np
import jax
import jax.numpy as jnp
from jax.experimental import pallas as pl
from jax.experimental.pallas import tpu as pltpu


def _encoder_kernel(x_ref, e_ref, mag_ref, vec_ref, *, inv_scale):
    """Per-row L2 norm + normalization, then the repeat-interleave expansion as
    a 0/1 expansion-matrix matmul on the MXU.  E arrives as float32 (no per-step
    cast); the 1/sqrt(KA*CA) scale rides in the per-row reciprocal, so no
    full-width divides remain."""
    x = x_ref[...]                                                   # (TB, D) f32
    mag = jnp.sqrt(jnp.sum(x * x, axis=1, keepdims=True)) + 1e-7     # (TB, 1)
    inv = inv_scale / mag                                            # TB divides only
    v = x * inv                                                      # VPU multiply
    # (TB, D) @ (D, TN) on the MXU. mag is recomputed per N-tile when the
    # expanded dim is tiled; that is TB*D VPU work vs TB*D*TN MXU work, i.e.
    # negligible, and keeps the kernel scratch-free.
    vec_ref[...] = jnp.dot(v, e_ref[...], preferred_element_type=jnp.float32)
    mag_ref[...] = mag


@functools.lru_cache(maxsize=None)
def _expansion_matrix_np(channels, kernel, channel_ancillas, kernel_ancillas):
    """Constant 0/1 expansion matrix implementing
         repeat_interleave(2**kernel_ancillas, dim=1)
      -> per-(K*KA) chunk repeat_interleave(2**channel_ancillas).
    Built once per config as float32 (cached on the host; the device copy is a
    jit constant, so placement/sharding is handled by XLA, not device_put)."""
    C, K = channels, kernel
    KA = 2 ** kernel_ancillas
    CA = 2 ** channel_ancillas
    D = C * K
    D_out = C * CA * K * KA
    j = np.arange(D_out)
    src = (j // (KA * K * CA)) * K + (j // KA) % K      # source column in v
    E = np.zeros((D, D_out), dtype=np.float32)
    E[src, j] = 1.0
    return E


@functools.lru_cache(maxsize=1)
def _tensorcores_per_chip():
    """2 for v7x-class parts (two TensorCores per chip), else 1."""
    try:
        kind = jax.devices()[0].device_kind.lower()
    except Exception:
        return 1
    return 2 if ("v7" in kind or "7x" in kind) else 1


def _pick_tiles(B, D, D_out, num_tc):
    """Chip-aware tile selection.

    TN: whole expanded dim unless the f32 E tile would exceed ~4 MiB, in which
        case D_out is tiled (powers of two, so divisibility is free) -- this is
        the v7x / scaled-config VMEM guard.
    TB: on multi-TC chips prefer >= num_tc grid tiles first (so the 'parallel'
        batch axis shards across TensorCores), then the largest tile; on
        single-TC chips just take the largest divisor tile (fewer, fatter grid
        steps amortize the ~0.35 us/step overhead).  A conservative VMEM
        estimate (double-buffered x, vec, E, mag) keeps us well under the
        32 MiB scoped default on every generation.
    """
    TN = D_out
    while D * TN * 4 > 4 * 1024 * 1024 and TN % 256 == 0:
        TN //= 2

    def vmem_ok(tb):
        est = 2 * (tb * D + tb * TN + D * TN + tb) * 4
        return est <= 16 * 1024 * 1024

    candidates = (1024, 512, 256, 128, 64, 32, 16, 8)
    if num_tc >= 2:
        for tb in candidates:
            if B % tb == 0 and B // tb >= num_tc and vmem_ok(tb):
                return tb, TN
    for tb in candidates:
        if B % tb == 0 and vmem_ok(tb):
            return tb, TN
    # Non-divisible / tiny batches: single un-pipelined tile (correct; padding
    # B up to a multiple of 128 upstream would be faster for odd batch sizes).
    return B, TN


@functools.partial(jax.jit, static_argnums=(1, 2, 3, 4))
def _encoder_jit(x, channels, kernel, channel_ancillas, kernel_ancillas):
    B, D = x.shape
    C, K = channels, kernel
    KA = 2 ** kernel_ancillas
    CA = 2 ** channel_ancillas
    if D != C * K:
        raise ValueError("input dim must be channels * kernel (both powers of two)")
    D_out = C * CA * K * KA

    # E as a float32 trace-time constant: uploaded once with the executable,
    # no per-call transfer, no per-step in-kernel cast.
    E = jnp.asarray(_expansion_matrix_np(C, K, channel_ancillas, kernel_ancillas))

    TB, TN = _pick_tiles(B, D, D_out, _tensorcores_per_chip())
    nb, nn = B // TB, D_out // TN

    inv_scale = np.float32(1.0 / np.sqrt(KA * CA))
    kfn = functools.partial(_encoder_kernel, inv_scale=inv_scale)

    mag, vec = pl.pallas_call(
        kfn,
        grid=(nb, nn),
        in_specs=[
            pl.BlockSpec((TB, D), lambda i, j: (i, 0)),
            pl.BlockSpec((D, TN), lambda i, j: (0, j)),   # tiled over D_out only
        ],
        out_specs=(
            # mag block index is constant across the inner N axis -> stays
            # VMEM-resident across N-tiles and is written back once per batch tile.
            pl.BlockSpec((TB, 1), lambda i, j: (i, 0)),
            pl.BlockSpec((TB, TN), lambda i, j: (i, j)),
        ),
        out_shape=(
            jax.ShapeDtypeStruct((B, 1), jnp.float32),
            jax.ShapeDtypeStruct((B, D_out), jnp.float32),
        ),
        compiler_params=pltpu.CompilerParams(
            dimension_semantics=("parallel", "arbitrary")),
    )(x, E)

    # .cfloat() in PyTorch -> complex64 with zero imaginary part.  Kept as a
    # single fused XLA convert inside this jit: Mosaic has no complex dtype and
    # lax.bitcast_convert_type rejects complex targets, so an interleaved
    # (re, 0) kernel output could not be reinterpreted for free and would cost
    # MORE bandwidth than this convert (the zero imag is a fused broadcast).
    vec_c = jax.lax.complex(vec, jnp.zeros_like(vec))
    return mag.reshape(-1), vec_c


def encoder_forward(x, channels, kernel, channel_ancillas=1, kernel_ancillas=1):
    return _encoder_jit(x, channels, kernel, channel_ancillas, kernel_ancillas)


def _numpy_reference(x, channels, kernel, channel_ancillas, kernel_ancillas):
    """Literal transcription of the PyTorch forward (minus the prints)."""
    x = np.asarray(x, dtype=np.float32)
    B = x.shape[0]
    K = kernel
    KA = 2 ** kernel_ancillas
    CA = 2 ** channel_ancillas
    mag = np.sqrt((x ** 2).sum(1, keepdims=True)) + 1e-7
    v = x / mag
    v = np.repeat(v, KA, axis=1) / np.sqrt(KA)
    v = (
        v.reshape(-1, K * KA)[:, None, :]
        .repeat(CA, axis=1)
        .reshape(B, -1)
        / np.sqrt(CA)
    )
    return mag.reshape(-1).astype(np.float32), v.astype(np.complex64)


if __name__ == "__main__":
    channels = 8          # channel_qubits = 3
    kernel = 16           # kernel_qubits = 4
    channel_ancillas = 1
    kernel_ancillas = 1
    batch = 8

    key = jax.random.PRNGKey(0)
    x = jax.random.normal(key, (batch, channels * kernel), dtype=jnp.float32)

    mag, vec = encoder_forward(
        x, channels, kernel, channel_ancillas, kernel_ancillas
    )
    mag = jax.block_until_ready(mag)
    vec = jax.block_until_ready(vec)

    mag_ref, vec_ref = _numpy_reference(
        np.asarray(x), channels, kernel, channel_ancillas, kernel_ancillas
    )
    assert mag.shape == (batch,) and mag.dtype == jnp.float32
    assert vec.shape == (batch, channels * 2 * kernel * 2)
    assert vec.dtype == jnp.complex64
    np.testing.assert_allclose(np.asarray(mag), mag_ref, rtol=1e-6, atol=1e-6)
    np.testing.assert_allclose(
        np.asarray(vec.real), vec_ref.real, rtol=1e-6, atol=1e-6
    )
    assert np.all(np.asarray(vec.imag) == 0.0)

    print("KERNEL_OK")
</pallas_src>

<mosaic_0001>
module attributes {stable_mosaic.version = 11 : i64} {
  func.func @_encoder_kernel(%arg0: i32, %arg1: i32, %arg2: memref<8x128xf32, #tpu.memory_space<vmem>>, %arg3: memref<128x512xf32, #tpu.memory_space<vmem>>, %arg4: memref<8x1xf32, #tpu.memory_space<vmem>>, %arg5: memref<8x512xf32, #tpu.memory_space<vmem>>) attributes {dimension_semantics = [#tpu.dimension_semantics<parallel>, #tpu.dimension_semantics<arbitrary>], iteration_bounds = array<i64: 1, 1>, scalar_prefetch = 0 : i64, scratch_operands = 0 : i64, tpu.core_type = #tpu.core_type<tc>, window_params = [{transform_indices = @transform_0, window_bounds = array<i64: 8, 128>}, {transform_indices = @transform_1, window_bounds = array<i64: 128, 512>}, {transform_indices = @transform_2, window_bounds = array<i64: 8, 1>}, {transform_indices = @transform_3, window_bounds = array<i64: 8, 512>}]} {
    %c0 = arith.constant 0 : index
    %c0_0 = arith.constant 0 : index
    %0 = vector.load %arg2[%c0, %c0_0] : memref<8x128xf32, #tpu.memory_space<vmem>>, vector<8x128xf32>
    %1 = arith.mulf %0, %0 : vector<8x128xf32>
    %cst = arith.constant dense<0.000000e+00> : vector<8xf32>
    %2 = vector.multi_reduction <add>, %1, %cst [1] : vector<8x128xf32> to vector<8xf32>
    %3 = vector.shape_cast %2 : vector<8xf32> to vector<8x1xf32>
    %4 = math.sqrt %3 : vector<8x1xf32>
    %cst_1 = arith.constant 1.000000e-07 : f32
    %5 = vector.broadcast %cst_1 : f32 to vector<8x1xf32>
    %6 = arith.addf %4, %5 : vector<8x1xf32>
    %cst_2 = arith.constant 5.000000e-01 : f32
    %7 = vector.broadcast %cst_2 : f32 to vector<8x1xf32>
    %8 = arith.divf %7, %6 : vector<8x1xf32>
    %9 = vector.broadcast %8 : vector<8x1xf32> to vector<8x128xf32>
    %10 = arith.mulf %0, %9 : vector<8x128xf32>
    %c0_3 = arith.constant 0 : index
    %c0_4 = arith.constant 0 : index
    %11 = vector.load %arg3[%c0_3, %c0_4] : memref<128x512xf32, #tpu.memory_space<vmem>>, vector<128x512xf32>
    %cst_5 = arith.constant dense<0.000000e+00> : vector<8x512xf32>
    %12 = tpu.matmul %10, %11, %cst_5 {dimension_numbers = #tpu.dot_dimension_numbers<[1], [0], [0], [1], [0, 0, 1, 1], [], []>} : vector<8x128xf32>, vector<128x512xf32>, vector<8x512xf32> -> vector<8x512xf32>
    %c0_6 = arith.constant 0 : index
    %c0_7 = arith.constant 0 : index
    %13 = vector.load %arg5[%c0_6, %c0_7] : memref<8x512xf32, #tpu.memory_space<vmem>>, vector<8x512xf32>
    tpu.vector_store %arg5[%c0_6, %c0_7], %12 {strides = array<i32>} : memref<8x512xf32, #tpu.memory_space<vmem>>, vector<8x512xf32>,
    %c0_8 = arith.constant 0 : index
    %c0_9 = arith.constant 0 : index
    %14 = vector.load %arg4[%c0_8, %c0_9] : memref<8x1xf32, #tpu.memory_space<vmem>>, vector<8x1xf32>
    tpu.vector_store %arg4[%c0_8, %c0_9], %6 {strides = array<i32>} : memref<8x1xf32, #tpu.memory_space<vmem>>, vector<8x1xf32>,
    return
  }
  func.func @transform_0(%arg0: i32, %arg1: i32) -> (i32, i32) {
    %c0_i32 = arith.constant 0 : i32
    %c0_i32_0 = arith.constant 0 : i32
    return %arg0, %c0_i32 : i32, i32
  }
  func.func @transform_1(%arg0: i32, %arg1: i32) -> (i32, i32) {
    %c0_i32 = arith.constant 0 : i32
    %c0_i32_0 = arith.constant 0 : i32
    return %c0_i32, %arg1 : i32, i32
  }
  func.func @transform_2(%arg0: i32, %arg1: i32) -> (i32, i32) {
    %c0_i32 = arith.constant 0 : i32
    %c0_i32_0 = arith.constant 0 : i32
    return %arg0, %c0_i32 : i32, i32
  }
  func.func @transform_3(%arg0: i32, %arg1: i32) -> (i32, i32) {
    %c0_i32 = arith.constant 0 : i32
    return %arg0, %arg1 : i32, i32
  }
}

</mosaic_0001>

<bundles_post_ra>
// kernel: custom-call
= control target key start
LH: loop header
LB: loop body
LE: loop exit
PB: predicated region body
PF: predicated region fallthrough
CT: control target
= control target key end

     0   :  { %s105_s0 = inlined_call_operand.vmem [shape: f32[8,512], index: 0, kind: input, shape index: {}]   ;;  %s106_s1 = inlined_call_operand.vmem [shape: f32[8,512], index: 1, kind: input, shape index: {}]   ;;  %s107_s2 = inlined_call_operand.hbm [shape: c64[8,512], index: 2, kind: output, shape index: {}]  }
   0x1   :  { %s3_s11 = scalar_lea.hbm %s107_s2, 32 }
   0x2   :  { %4 = vsyncpa [#allocation0], 0  ;;  %s6_s14 = sshll.u32 %s105_s0, 4  ;;  %s8_s17 = sshll.u32 %s107_s2, 4  ;;  %s7_s14 = int_to_ptr.vmem [resolvable:$true] %s6_s14  ;;  %s9_s17 = int_to_ptr.hbm [resolvable:$true] %s8_s17 }
   0x3   :  { %11 = dma.vmem_to_hbm [thread:$0]  %s7_s14, 512, %s9_s17, [#allocation0] }
   0x4   :  { %74 = dma.done.wait [#allocation0], 512  }
   0x5   :  { %75 = vsyncadd [#allocation0], 4294966784 }
   0x6   :  { %14 = vsyncpa [#allocation0], 1 }
   0x7   :  { %15 = vsyncpa [#allocation1], 0  ;;  %s17_s20 = sshll.u32 %s106_s1, 4  ;;  %s19_s21 = sshll.u32 %s3_s11, 4  ;;  %s18_s20 = int_to_ptr.vmem [resolvable:$true] %s17_s20  ;;  %s20_s21 = int_to_ptr.hbm [resolvable:$true] %s19_s21 }
   0x8   :  { %22 = dma.vmem_to_hbm [thread:$0]  %s18_s20, 512, %s20_s21, [#allocation1] }
   0x9   :  { %76 = dma.done.wait [#allocation1], 512  }
   0xa   :  { %77 = vsyncadd [#allocation1], 4294966784 }
   0xb   :  { %25 = vsyncpa [#allocation1], 1 }

// kernel: _encoder_jit.1
= control target key start
LH: loop header
LB: loop body
LE: loop exit
PB: predicated region body
PF: predicated region fallthrough
CT: control target
= control target key end

     0   :  { %9 = vsyncpa [#allocation3], 0  ;;  %s355_s0 = inlined_call_operand.hbm [shape: f32[8,128], index: 0, kind: input, shape index: {}]   ;;  %s356_s1 = inlined_call_operand.hbm [shape: f32[128,512], index: 1, kind: input, shape index: {}]   ;;  %s357_s2 = inlined_call_operand.vmem [shape: f32[8,1], index: 2, kind: output, shape index: {0}]   ;;  %s358_s3 = inlined_call_operand.vmem [shape: f32[8,512], index: 3, kind: output, shape index: {1}]  }
   0x1   :  { %s16_s14 = sshll.u32 %s355_s0, 4  ;;  %s17_s14 = int_to_ptr.hbm [resolvable:$true] %s16_s14 }
   0x2   :  { %10 = vsyncpa [#allocation5], 0  ;;  %s296_s15 = smov [#allocation2]   ;;  %s26_s19 = sshll.u32 %s356_s1, 4  ;;  %s27_s19 = int_to_ptr.hbm [resolvable:$true] %s26_s19 }
   0x3   :  { %s18_s16 = sshll.u32 %s296_s15, 4  ;;  %s297_s20 = smov [#allocation4]   ;;  %s19_s16 = int_to_ptr.vmem [resolvable:$true] %s18_s16 }
   0x4   :  { %21 = dma.hbm_to_vmem [thread:$0]  %s17_s14, 128, %s19_s16, [#allocation3]  }
   0x5   :  { %s28_s21 = sshll.u32 %s297_s20, 4  ;;  %s298_s22 = smov 512   ;;  %s29_s21 = int_to_ptr.vmem [resolvable:$true] %s28_s21 }
   0x6   :  { %s299_s23 = smov 32  }
   0x7   :  { %34 = dma.hbm_to_vmem [thread:$0]  %s27_s19, 8192, %s29_s21, [#allocation5], %s298_s22, %s298_s22, %s299_s23  }
   0x8   :  { %292 = dma.done.wait [#allocation3], 128  }
   0x9   :  { %293 = vsyncadd [#allocation3], 4294967168 }
   0xa   :  { %294 = dma.done.wait [#allocation5], 8192  }
   0xb   :  { %295 = vsyncadd [#allocation5], 4294959104  ;;  %v326_v0 = vld [vmem:[#allocation2] sm:$0xff]  ;;  %v136_v2 = vld [vmem:[#allocation4 + $0x1e0] sm:$0xff]  ;;  %vm224_vm2 = vcmask 7168  }
   0xc   :  { %v44_v1 = vmul.f32 %v326_v0, %v326_v0  ;;  %v137_v3 = vld [vmem:[#allocation4 + $0x1e8] sm:$0xff]  ;;  %v138_v4 = vld [vmem:[#allocation4 + $0x1f0] sm:$0xff]  ;;  %140 = vmatpush.msra.mxu0 %v136_v2  ;;  %v139_v5 = vld [vmem:[#allocation4 + $0x1f8] sm:$0xff] }
   0xd   :  { %160 = vmatpush.msra.mxu1 %v137_v3  ;;  %180 = vmatpush.msra.mxu2 %v138_v4  ;;  %v132_v6 = vld [vmem:[#allocation4 + $0x1c0] sm:$0xff]  ;;  %v133_v7 = vld [vmem:[#allocation4 + $0x1c8] sm:$0xff]  ;;  %v134_v8 = vld [vmem:[#allocation4 + $0x1d0] sm:$0xff] }
   0xe   :  { %45 = vadd.xlane.f32.xlu0 %v44_v1  ;;  %200 = vmatpush.msra.mxu3 %v139_v5  ;;  %v135_v9 = vld [vmem:[#allocation4 + $0x1d8] sm:$0xff]  ;;  %v128_v10 = vld [vmem:[#allocation4 + $0x1a0] sm:$0xff]  ;;  %v129_v11 = vld [vmem:[#allocation4 + $0x1a8] sm:$0xff] }
   0xf   :  { %141 = vmatpush.msra.mxu0 %v132_v6  ;;  %161 = vmatpush.msra.mxu1 %v133_v7  ;;  %v130_v12 = vld [vmem:[#allocation4 + $0x1b0] sm:$0xff]  ;;  %v131_v13 = vld [vmem:[#allocation4 + $0x1b8] sm:$0xff]  ;;  %v124_v14 = vld [vmem:[#allocation4 + $0x180] sm:$0xff] }
  0x10   :  { %181 = vmatpush.msra.mxu2 %v134_v8  ;;  %201 = vmatpush.msra.mxu3 %v135_v9  ;;  %v125_v15 = vld [vmem:[#allocation4 + $0x188] sm:$0xff]  ;;  %v126_v16 = vld [vmem:[#allocation4 + $0x190] sm:$0xff]  ;;  %v127_v17 = vld [vmem:[#allocation4 + $0x198] sm:$0xff] }
  0x11   :  { %142 = vmatpush.msra.mxu0 %v128_v10  ;;  %162 = vmatpush.msra.mxu1 %v129_v11  ;;  %v120_v18 = vld [vmem:[#allocation4 + $0x160] sm:$0xff]  ;;  %v121_v19 = vld [vmem:[#allocation4 + $0x168] sm:$0xff]  ;;  %v122_v20 = vld [vmem:[#allocation4 + $0x170] sm:$0xff] }
  0x12   :  { %182 = vmatpush.msra.mxu2 %v130_v12  ;;  %202 = vmatpush.msra.mxu3 %v131_v13  ;;  %v123_v21 = vld [vmem:[#allocation4 + $0x178] sm:$0xff]  ;;  %v116_v22 = vld [vmem:[#allocation4 + $0x140] sm:$0xff]  ;;  %v117_v23 = vld [vmem:[#allocation4 + $0x148] sm:$0xff] }
  0x13   :  { %143 = vmatpush.msra.mxu0 %v124_v14  ;;  %163 = vmatpush.msra.mxu1 %v125_v15  ;;  %v118_v24 = vld [vmem:[#allocation4 + $0x150] sm:$0xff]  ;;  %v119_v25 = vld [vmem:[#allocation4 + $0x158] sm:$0xff]  ;;  %v112_v26 = vld [vmem:[#allocation4 + $0x120] sm:$0xff] }
  0x14   :  { %183 = vmatpush.msra.mxu2 %v126_v16  ;;  %203 = vmatpush.msra.mxu3 %v127_v17  ;;  %v113_v27 = vld [vmem:[#allocation4 + $0x128] sm:$0xff]  ;;  %v114_v28 = vld [vmem:[#allocation4 + $0x130] sm:$0xff]  ;;  %v115_v29 = vld [vmem:[#allocation4 + $0x138] sm:$0xff] }
  0x15   :  { %144 = vmatpush.msra.mxu0 %v120_v18  ;;  %164 = vmatpush.msra.mxu1 %v121_v19  ;;  %v108_v30 = vld [vmem:[#allocation4 + $0x100] sm:$0xff]  ;;  %v109_v31 = vld [vmem:[#allocation4 + $0x108] sm:$0xff]  ;;  %v110_v32 = vld [vmem:[#allocation4 + $0x110] sm:$0xff] }
  0x16   :  { %184 = vmatpush.msra.mxu2 %v122_v20  ;;  %204 = vmatpush.msra.mxu3 %v123_v21  ;;  %v111_v33 = vld [vmem:[#allocation4 + $0x118] sm:$0xff]  ;;  %v104_v34 = vld [vmem:[#allocation4 + $0xe0] sm:$0xff]  ;;  %v105_v35 = vld [vmem:[#allocation4 + $0xe8] sm:$0xff] }
  0x17   :  { %145 = vmatpush.msra.mxu0 %v116_v22  ;;  %165 = vmatpush.msra.mxu1 %v117_v23  ;;  %v106_v36 = vld [vmem:[#allocation4 + $0xf0] sm:$0xff]  ;;  %v107_v37 = vld [vmem:[#allocation4 + $0xf8] sm:$0xff]  ;;  %v100_v38 = vld [vmem:[#allocation4 + $0xc0] sm:$0xff] }
  0x18   :  { %185 = vmatpush.msra.mxu2 %v118_v24  ;;  %205 = vmatpush.msra.mxu3 %v119_v25  ;;  %v101_v39 = vld [vmem:[#allocation4 + $0xc8] sm:$0xff]  ;;  %v102_v40 = vld [vmem:[#allocation4 + $0xd0] sm:$0xff]  ;;  %v103_v41 = vld [vmem:[#allocation4 + $0xd8] sm:$0xff] }
  0x19   :  { %146 = vmatpush.msra.mxu0 %v112_v26  ;;  %166 = vmatpush.msra.mxu1 %v113_v27  ;;  %v96_v42 = vld [vmem:[#allocation4 + $0xa0] sm:$0xff]  ;;  %v97_v43 = vld [vmem:[#allocation4 + $0xa8] sm:$0xff]  ;;  %v98_v45 = vld [vmem:[#allocation4 + $0xb0] sm:$0xff] }
  0x1a   :  { %186 = vmatpush.msra.mxu2 %v114_v28  ;;  %206 = vmatpush.msra.mxu3 %v115_v29  ;;  %v99_v46 = vld [vmem:[#allocation4 + $0xb8] sm:$0xff]  ;;  %v92_v47 = vld [vmem:[#allocation4 + $0x80] sm:$0xff]  ;;  %v93_v48 = vld [vmem:[#allocation4 + $0x88] sm:$0xff] }
  0x1b   :  { %147 = vmatpush.msra.mxu0 %v108_v30  ;;  %167 = vmatpush.msra.mxu1 %v109_v31  ;;  %v94_v49 = vld [vmem:[#allocation4 + $0x90] sm:$0xff]  ;;  %v95_v50 = vld [vmem:[#allocation4 + $0x98] sm:$0xff]  ;;  %v88_v51 = vld [vmem:[#allocation4 + $0x60] sm:$0xff] }
  0x1c   :  { %187 = vmatpush.msra.mxu2 %v110_v32  ;;  %207 = vmatpush.msra.mxu3 %v111_v33  ;;  %v89_v52 = vld [vmem:[#allocation4 + $0x68] sm:$0xff]  ;;  %v90_v53 = vld [vmem:[#allocation4 + $0x70] sm:$0xff]  ;;  %v91_v54 = vld [vmem:[#allocation4 + $0x78] sm:$0xff] }
  0x1d   :  { %148 = vmatpush.msra.mxu0 %v104_v34  ;;  %168 = vmatpush.msra.mxu1 %v105_v35  ;;  %v84_v55 = vld [vmem:[#allocation4 + $0x40] sm:$0xff]  ;;  %v85_v56 = vld [vmem:[#allocation4 + $0x48] sm:$0xff]  ;;  %v86_v57 = vld [vmem:[#allocation4 + $0x50] sm:$0xff] }
  0x1e   :  { %188 = vmatpush.msra.mxu2 %v106_v36  ;;  %208 = vmatpush.msra.mxu3 %v107_v37  ;;  %v87_v58 = vld [vmem:[#allocation4 + $0x58] sm:$0xff]  ;;  %v80_v60 = vld [vmem:[#allocation4 + $0x20] sm:$0xff]  ;;  %v81_v61 = vld [vmem:[#allocation4 + $0x28] sm:$0xff] }
  0x1f   :  { %149 = vmatpush.msra.mxu0 %v100_v38  ;;  %169 = vmatpush.msra.mxu1 %v101_v39  ;;  %v82_v63 = vld [vmem:[#allocation4 + $0x30] sm:$0xff]  ;;  %v83_v1 = vld [vmem:[#allocation4 + $0x38] sm:$0xff]  ;;  %v76_v2 = vld [vmem:[#allocation4] sm:$0xff] }
  0x20   :  { %189 = vmatpush.msra.mxu2 %v102_v40  ;;  %209 = vmatpush.msra.mxu3 %v103_v41  ;;  %v77_v3 = vld [vmem:[#allocation4 + $0x8] sm:$0xff]  ;;  %v78_v5 = vld [vmem:[#allocation4 + $0x10] sm:$0xff]  ;;  %v79_v6 = vld [vmem:[#allocation4 + $0x18] sm:$0xff] }
  0x21   :  { %150 = vmatpush.msra.mxu0 %v96_v42  ;;  %170 = vmatpush.msra.mxu1 %v97_v43 }
  0x22   :  { %190 = vmatpush.msra.mxu2 %v98_v45  ;;  %210 = vmatpush.msra.mxu3 %v99_v46 }
  0x23   :  { %151 = vmatpush.msra.mxu0 %v92_v47  ;;  %171 = vmatpush.msra.mxu1 %v93_v48 }
  0x24   :  { %191 = vmatpush.msra.mxu2 %v94_v49  ;;  %211 = vmatpush.msra.mxu3 %v95_v50 }
  0x25   :  { %152 = vmatpush.msra.mxu0 %v88_v51  ;;  %172 = vmatpush.msra.mxu1 %v89_v52 }
  0x26   :  { %192 = vmatpush.msra.mxu2 %v90_v53  ;;  %212 = vmatpush.msra.mxu3 %v91_v54 }
  0x27   :  { %153 = vmatpush.msra.mxu0 %v84_v55  ;;  %173 = vmatpush.msra.mxu1 %v85_v56 }
  0x28   :  { %193 = vmatpush.msra.mxu2 %v86_v57  ;;  %213 = vmatpush.msra.mxu3 %v87_v58 }
  0x29   :  { %154 = vmatpush.msra.mxu0 %v80_v60  ;;  %174 = vmatpush.msra.mxu1 %v81_v61 }
  0x2a   :  { %194 = vmatpush.msra.mxu2 %v82_v63  ;;  %214 = vmatpush.msra.mxu3 %v83_v1 }
  0x2b   :  { %155 = vmatpush.msra.mxu0 %v76_v2  ;;  %175 = vmatpush.msra.mxu1 %v77_v3 }
  0x2c   :  { %195 = vmatpush.msra.mxu2 %v78_v5  ;;  %215 = vmatpush.msra.mxu3 %v79_v6 }
  0x81   :  { %v330_v44 = vpop.xlane.xlu0 %45 }
  0x82   :  { %240 = vrsqrt.f32 %v330_v44  ;;  %vm54_vm0 = vcmp.eq.f32.partialorder %v330_v44, inf  ;;  %v57_v11 = vand.u32 2147483648, %v330_v44  ;;  %vm56_vm1 = vcmp.eq.f32.partialorder %v330_v44, 0.0 }
  0x88   :  { %v241_v59 = vpop.eup %240 }
  0x89   :  { %v48_v62 = vmul.f32 %v241_v59, %v330_v44 }
  0x8b   :  { %v49_v4 = vmul.f32 %v241_v59, %v48_v62 }
  0x8d   :  { %v50_v7 = vmul.f32 0.5, %v49_v4 }
  0x8f   :  { %v51_v8 = vsub.f32 1.5, %v50_v7 }
  0x91   :  { %v52_v9 = vmul.f32 %v241_v59, %v51_v8 }
  0x93   :  { %v53_v10 = vmul.f32 %v52_v9, %v330_v44 }
  0x95   :  { %v55_v12 = vsel %vm54_vm0, %v330_v44, %v53_v10 }
  0x96   :  { %v58_v13 = vsel %vm56_vm1, %v57_v11, %v55_v12 }
  0x97   :  { %v59_v14 = vadd.f32 1e-07, %v58_v13 }
  0x99   :  { %242 = vrcp.f32 %v59_v14  ;;  %225 = vst.msk [vmem:[%s357_s2] sm:$0xff] %vm224_vm2, %v59_v14  ;;  %v71_v18 = vand.u32 2147483648, %v59_v14  ;;  %v69_v20 = vand.u32 2147483647, %v59_v14  ;;  %vm65_vm4 = vweird.f32 %v59_v14 }
  0x9b   :  { %v72_v22 = vor.u32 1.1754944e-38, %v71_v18  ;;  %vm70_vm6 = vcmp.eq.f32.partialorder %v69_v20, 8.507059e+37 }
  0x9f   :  { %v243_v15 = vpop.eup %242 }
  0xa0   :  { %v61_v16 = vmul.f32 %v243_v15, %v59_v14  ;;  %vm66_vm3 = vweird.f32 %v243_v15 }
  0xa1   :  { %vm67_vm5 = vmor %vm65_vm4, %vm66_vm3 }
  0xa2   :  { %v62_v17 = vsub.f32 1.0, %v61_v16 }
  0xa4   :  { %v63_v19 = vmul.f32 %v243_v15, %v62_v17 }
  0xa6   :  { %v64_v21 = vadd.f32 %v243_v15, %v63_v19 }
  0xa8   :  { %v68_v23 = vsel %vm67_vm5, %v243_v15, %v64_v21 }
  0xa9   :  { %v73_v24 = vsel %vm70_vm6, %v72_v22, %v68_v23 }
  0xaa   :  { %v74_v25 = vmul.f32 0.5, %v73_v24 }
  0xac   :  { %v75_v26 = vmul.f32 %v74_v25, %v326_v0 }
  0xae   :  { %156 = vmatmul.f32.vlgmr.msra.gmra.mxu0 %v75_v26  ;;  %176 = vmatmul.f32.vlgmr.msra.gmra.mxu1 %v75_v26 }
  0xaf   :  { %196 = vmatmul.f32.vlgmr.msra.gmra.mxu2 %v75_v26  ;;  %216 = vmatmul.f32.vlgmr.msra.gmra.mxu3 %v75_v26 }
 0x12b   :  { %v157_v27 = vpop.f32.mrf.mxu0  ;;  %v177_v28 = vpop.f32.mrf.mxu1 }
 0x12c   :  { %220 = vst [vmem:[%s358_s3] sm:$0xff] %v157_v27 }
 0x12d   :  { %221 = vst [vmem:[%s358_s3 + $0x8] sm:$0xff] %v177_v28 }
 0x132   :  { %v197_v29 = vpop.f32.mrf.mxu2  ;;  %v217_v30 = vpop.f32.mrf.mxu3 }
 0x133   :  { %222 = vst [vmem:[%s358_s3 + $0x10] sm:$0xff] %v197_v29 }
 0x134   :  { %223 = vst [vmem:[%s358_s3 + $0x18] sm:$0xff] %v217_v30 }
 0x135   :  { %234 = vsyncpa [#allocation3], 1 }
 0x136   :  { %235 = vsyncpa [#allocation5], 1 }

</bundles_post_ra>
